<compile_context>
chip_gen: v7x
topology: tpu7x:2x2x1
jax: 0.10.0
libtpu: 0.0.40
codegen_flags: <defaults>
</compile_context>

<pallas_src>
import functools

import jax
import jax.numpy as jnp
from jax.experimental import pallas as pl
from jax.experimental.pallas import tpu as pltpu


def _round_up(x, m):
    return ((x + m - 1) // m) * m


def _cdiv(a, b):
    return -(-a // b)


def _balanced_block(n, cap, align=8):
    """Split n into roughly-equal tiles of at most `cap`, aligned to `align`."""
    n_tiles = _cdiv(n, cap)
    return _round_up(_cdiv(n, n_tiles), align)


def _vmem_budget_bytes():
    try:
        cap = getattr(pltpu.get_tpu_info(), "vmem_capacity_bytes", None)
    except Exception:
        cap = None
    if not cap:
        return 48 * 1024 * 1024  # safe on every generation (incl. v7x's 64 MiB)
    # ~48 MiB on v7x (64 MiB physical), ~96 MiB on v5e/v6e (128 MiB physical).
    return min(int(cap) * 3 // 4, 100 * 1024 * 1024)


def ca_sa_kernel(f1_ref, f2_ref, wq_ref, bq_ref, wkv_ref, bkv_ref,
                 out_ref, attn_ref, k_scratch, v_scratch,
                 *, bb, tq, n2p, dp, n2_valid):
    cdt = k_scratch.dtype  # MXU operand dtype (f32 or bf16); accumulation is f32.

    # ---- K/V projection: once per batch block, reused by every query tile. ----
    @pl.when(pl.program_id(1) == 0)
    def _compute_kv():
        f2 = f2_ref[...].reshape(bb * n2p, dp)                      # (Bb*N2p, Dp)
        kv = (jnp.dot(f2, wkv_ref[...], preferred_element_type=jnp.float32)
              + bkv_ref[...])                                       # (Bb*N2p, 2*Dp)
        k_scratch[...] = kv[:, :dp].reshape(bb, n2p, dp).astype(cdt)
        v_scratch[...] = kv[:, dp:].reshape(bb, n2p, dp).astype(cdt)

    # ---- Q projection for this query tile (batch fused into the M dim). ----
    f1 = f1_ref[...].reshape(bb * tq, dp)                           # (Bb*tq, Dp)
    q = (jnp.dot(f1, wq_ref[...], preferred_element_type=jnp.float32)
         + bq_ref[...]).reshape(bb, tq, dp).astype(cdt)

    # ---- scores = Q @ K^T (batched, contracting last dims; no K transpose). ----
    scores = jnp.einsum("bqd,bkd->bqk", q, k_scratch[...],
                        preferred_element_type=jnp.float32)         # (Bb, tq, N2p)

    if n2_valid != n2p:  # trace-time constant: mask padded key columns
        col = jax.lax.broadcasted_iota(jnp.int32, scores.shape, 2)
        scores = jnp.where(col < n2_valid, scores, jnp.float32(-1e30))

    # ---- Row softmax in f32 (exact normalization, matches torch.Softmax). ----
    m = jnp.max(scores, axis=-1, keepdims=True)
    p = jnp.exp(scores - m)
    attn = p / jnp.sum(p, axis=-1, keepdims=True)

    # ---- out = attn @ V (batched), f32 accumulation. ----
    out = jnp.einsum("bqk,bkd->bqd", attn.astype(cdt), v_scratch[...],
                     preferred_element_type=jnp.float32)

    out_ref[...] = out.astype(out_ref.dtype)
    attn_ref[...] = attn.astype(attn_ref.dtype)


def ca_sa_vis(feat1, feat2, params, *, compute_dtype=None, attn_dtype=jnp.float32,
              max_block_q=256, max_block_b=8):
    """feat1: (B, N1, D), feat2: (B, N2, D). Returns (out, attn) like the module."""
    B, N1, D = feat1.shape
    B2, N2, D2 = feat2.shape
    assert B2 == B and D2 == D

    out_dtype = feat1.dtype
    cdt = compute_dtype if compute_dtype is not None else feat1.dtype

    # Lane-dense layouts: feature dim and key dim padded to multiples of 128.
    Dp = _round_up(D, 128)
    N2p = _round_up(N2, 128)

    budget = _vmem_budget_bytes()
    c_sz = jnp.dtype(cdt).itemsize
    o_sz = jnp.dtype(out_dtype).itemsize
    a_sz = jnp.dtype(attn_dtype).itemsize

    def vmem_estimate(bb, tq):
        f1_b = bb * tq * Dp * c_sz
        f2_b = bb * N2p * Dp * c_sz
        out_b = bb * tq * Dp * o_sz
        attn_b = bb * tq * N2p * a_sz
        w_b = (Dp * Dp + Dp * 2 * Dp) * c_sz + 3 * Dp * 4
        kv_scratch = 2 * bb * N2p * Dp * c_sz
        # rough in-kernel f32 temporaries: K/V + Q accumulators, scores + probs
        temps = (bb * N2p * 2 * Dp + bb * tq * Dp + 2 * bb * tq * N2p) * 4
        return 2 * (f1_b + f2_b + out_b + attn_b + w_b) + kv_scratch + temps

    # Budget-driven tile selection.
    block_b = max(1, min(B, max_block_b))
    q_cap = max_block_q
    block_q = _balanced_block(N1, q_cap)
    while block_b > 1 and vmem_estimate(block_b, block_q) > budget:
        block_b -= 1
    while q_cap > 8 and vmem_estimate(block_b, block_q) > budget:
        q_cap = max(8, q_cap // 2)
        block_q = _balanced_block(N1, q_cap)

    Bp = _round_up(B, block_b)          # pad batch instead of degenerating to bb=1
    N1p = block_q * _cdiv(N1, block_q)  # balanced split -> minimal query padding

    # Zero-pad activations (exact: padded cols/rows contribute nothing).
    f1 = jnp.pad(feat1, ((0, Bp - B), (0, N1p - N1), (0, Dp - D))).astype(cdt)
    f2 = jnp.pad(feat2, ((0, Bp - B), (0, N2p - N2), (0, Dp - D))).astype(cdt)

    def pad_wT(w):  # torch (out, in) -> (in, out), zero-padded to (Dp, Dp)
        return jnp.pad(w.T, ((0, Dp - D), (0, Dp - D)))

    def pad_b(b):
        return jnp.pad(b, (0, Dp - D))

    wq = pad_wT(params["Wq"]).astype(cdt)
    wkv = jnp.concatenate([pad_wT(params["Wk"]), pad_wT(params["Wv"])],
                          axis=1).astype(cdt)                       # (Dp, 2*Dp)
    bq = pad_b(params["bq"]).reshape(1, Dp).astype(jnp.float32)
    bkv = jnp.concatenate([pad_b(params["bk"]), pad_b(params["bv"])]
                          ).reshape(1, 2 * Dp).astype(jnp.float32)  # (1, 2*Dp)

    grid = (Bp // block_b, N1p // block_q)

    kernel = functools.partial(ca_sa_kernel, bb=block_b, tq=block_q,
                               n2p=N2p, dp=Dp, n2_valid=N2)

    out_pad, attn_pad = pl.pallas_call(
        kernel,
        out_shape=(
            jax.ShapeDtypeStruct((Bp, N1p, Dp), out_dtype),
            jax.ShapeDtypeStruct((Bp, N1p, N2p), attn_dtype),
        ),
        grid_spec=pltpu.PrefetchScalarGridSpec(
            num_scalar_prefetch=0,
            grid=grid,
            in_specs=[
                pl.BlockSpec((block_b, block_q, Dp), lambda b, q: (b, q, 0)),
                pl.BlockSpec((block_b, N2p, Dp), lambda b, q: (b, 0, 0)),
                pl.BlockSpec((Dp, Dp), lambda b, q: (0, 0)),
                pl.BlockSpec((1, Dp), lambda b, q: (0, 0)),
                pl.BlockSpec((Dp, 2 * Dp), lambda b, q: (0, 0)),
                pl.BlockSpec((1, 2 * Dp), lambda b, q: (0, 0)),
            ],
            out_specs=[
                pl.BlockSpec((block_b, block_q, Dp), lambda b, q: (b, q, 0)),
                pl.BlockSpec((block_b, block_q, N2p), lambda b, q: (b, q, 0)),
            ],
            scratch_shapes=[
                pltpu.VMEM((block_b, N2p, Dp), cdt),   # K (reused across q tiles)
                pltpu.VMEM((block_b, N2p, Dp), cdt),   # V
            ],
        ),
        compiler_params=pltpu.CompilerParams(
            # q axis carries the K/V scratch -> "arbitrary"; batch axis parallel.
            dimension_semantics=("parallel", "arbitrary"),
            vmem_limit_bytes=budget,
        ),
    )(f1, f2, wq, bq, wkv, bkv)

    out = out_pad[:B, :N1, :D]
    attn = attn_pad[:B, :N1, :N2]
    return out, attn


def init_params(key, dim):
    ks = jax.random.split(key, 6)
    scale = 1.0 / jnp.sqrt(dim)
    return {
        "Wq": jax.random.uniform(ks[0], (dim, dim), jnp.float32, -scale, scale),
        "bq": jax.random.uniform(ks[1], (dim,), jnp.float32, -scale, scale),
        "Wk": jax.random.uniform(ks[2], (dim, dim), jnp.float32, -scale, scale),
        "bk": jax.random.uniform(ks[3], (dim,), jnp.float32, -scale, scale),
        "Wv": jax.random.uniform(ks[4], (dim, dim), jnp.float32, -scale, scale),
        "bv": jax.random.uniform(ks[5], (dim,), jnp.float32, -scale, scale),
    }


def ca_sa_vis_ref(feat1, feat2, params):
    q = feat1 @ params["Wq"].T + params["bq"]
    k = feat2 @ params["Wk"].T + params["bk"]
    v = feat2 @ params["Wv"].T + params["bv"]
    attn = jax.nn.softmax(jnp.einsum("bnd,bmd->bnm", q, k), axis=-1)
    out = jnp.einsum("bnm,bmd->bnd", attn, v)
    return out, attn


if __name__ == "__main__":
    key = jax.random.PRNGKey(0)
    dim = 32
    params = init_params(jax.random.fold_in(key, 99), dim)

    # Test 1: module-default small shape (single grid step, key-column masking).
    B, N1, N2 = 2, 8, 8
    k1, k2 = jax.random.split(key, 2)
    feat1 = jax.random.normal(k1, (B, N1, dim), jnp.float32)
    feat2 = jax.random.normal(k2, (B, N2, dim), jnp.float32)
    out_ref, attn_ref = ca_sa_vis_ref(feat1, feat2, params)
    out, attn = ca_sa_vis(feat1, feat2, params)
    jax.block_until_ready((out, attn))
    assert jnp.allclose(out, out_ref, atol=1e-3, rtol=1e-3)
    assert jnp.allclose(attn, attn_ref, atol=1e-3, rtol=1e-3)

    # Test 2: multiple query tiles + multiple/padded batch blocks -> exercises the
    # q==0-gated K/V scratch reuse and the batch padding path.
    Bb, N1b, N2b = 5, 24, 40
    k3, k4 = jax.random.split(jax.random.fold_in(key, 7), 2)
    feat1b = jax.random.normal(k3, (Bb, N1b, dim), jnp.float32)
    feat2b = jax.random.normal(k4, (Bb, N2b, dim), jnp.float32)
    out_refb, attn_refb = ca_sa_vis_ref(feat1b, feat2b, params)
    out_b, attn_b = ca_sa_vis(feat1b, feat2b, params, max_block_q=8, max_block_b=2)
    jax.block_until_ready((out_b, attn_b))
    assert jnp.allclose(out_b, out_refb, atol=1e-3, rtol=1e-3)
    assert jnp.allclose(attn_b, attn_refb, atol=1e-3, rtol=1e-3)

    # Test 3: bf16 MXU-operand path (v6e/v7x recommendation); softmax / accum /
    # returned `out` stay f32.
    out_bf, attn_bf = ca_sa_vis(feat1, feat2, params, compute_dtype=jnp.bfloat16)
    jax.block_until_ready((out_bf, attn_bf))
    assert jnp.allclose(out_bf, out_ref, atol=5e-2, rtol=5e-2)
    assert jnp.allclose(attn_bf, attn_ref, atol=2e-2, rtol=2e-2)

    print("KERNEL_OK")
</pallas_src>

<mosaic_0001>
module attributes {stable_mosaic.version = 11 : i64} {
  func.func @ca_sa_kernel(%arg0: i32, %arg1: i32, %arg2: memref<2x8x128xf32, #tpu.memory_space<vmem>>, %arg3: memref<2x128x128xf32, #tpu.memory_space<vmem>>, %arg4: memref<128x128xf32, #tpu.memory_space<vmem>>, %arg5: memref<1x128xf32, #tpu.memory_space<vmem>>, %arg6: memref<128x256xf32, #tpu.memory_space<vmem>>, %arg7: memref<1x256xf32, #tpu.memory_space<vmem>>, %arg8: memref<2x8x128xf32, #tpu.memory_space<vmem>>, %arg9: memref<2x8x128xf32, #tpu.memory_space<vmem>>, %arg10: memref<2x128x128xf32, #tpu.memory_space<vmem>>, %arg11: memref<2x128x128xf32, #tpu.memory_space<vmem>>) attributes {dimension_semantics = [#tpu.dimension_semantics<parallel>, #tpu.dimension_semantics<arbitrary>], iteration_bounds = array<i64: 1, 1>, scalar_prefetch = 0 : i64, scratch_operands = 2 : i64, tpu.core_type = #tpu.core_type<tc>, window_params = [{transform_indices = @transform_0, window_bounds = array<i64: 2, 8, 128>}, {transform_indices = @transform_1, window_bounds = array<i64: 2, 128, 128>}, {pipeline_mode = #tpu.pipeline_mode<synchronous>, transform_indices = @transform_2, window_bounds = array<i64: 128, 128>}, {pipeline_mode = #tpu.pipeline_mode<synchronous>, transform_indices = @transform_3, window_bounds = array<i64: 1, 128>}, {pipeline_mode = #tpu.pipeline_mode<synchronous>, transform_indices = @transform_4, window_bounds = array<i64: 128, 256>}, {pipeline_mode = #tpu.pipeline_mode<synchronous>, transform_indices = @transform_5, window_bounds = array<i64: 1, 256>}, {transform_indices = @transform_6, window_bounds = array<i64: 2, 8, 128>}, {transform_indices = @transform_7, window_bounds = array<i64: 2, 8, 128>}]} {
    %c0_i32 = arith.constant 0 : i32
    %0 = arith.cmpi eq, %arg1, %c0_i32 : i32
    %1 = arith.extui %0 : i1 to i32
    %c0_i32_0 = arith.constant 0 : i32
    %2 = arith.cmpi ne, %1, %c0_i32_0 : i32
    scf.if %2 {
      %c0_24 = arith.constant 0 : index
      %c0_25 = arith.constant 0 : index
      %c0_26 = arith.constant 0 : index
      %31 = vector.load %arg3[%c0_24, %c0_25, %c0_26] : memref<2x128x128xf32, #tpu.memory_space<vmem>>, vector<2x128x128xf32>
      %32 = vector.shape_cast %31 : vector<2x128x128xf32> to vector<256x128xf32>
      %c0_27 = arith.constant 0 : index
      %c0_28 = arith.constant 0 : index
      %33 = vector.load %arg6[%c0_27, %c0_28] : memref<128x256xf32, #tpu.memory_space<vmem>>, vector<128x256xf32>
      %cst_29 = arith.constant dense<0.000000e+00> : vector<256x256xf32>
      %34 = tpu.matmul %32, %33, %cst_29 {dimension_numbers = #tpu.dot_dimension_numbers<[1], [0], [0], [1], [0, 0, 1, 1], [], []>} : vector<256x128xf32>, vector<128x256xf32>, vector<256x256xf32> -> vector<256x256xf32>
      %c0_30 = arith.constant 0 : index
      %c0_31 = arith.constant 0 : index
      %35 = vector.load %arg7[%c0_30, %c0_31] : memref<1x256xf32, #tpu.memory_space<vmem>>, vector<1x256xf32>
      %36 = vector.broadcast %35 : vector<1x256xf32> to vector<256x256xf32>
      %37 = arith.addf %34, %36 : vector<256x256xf32>
      %38 = vector.extract_strided_slice %37 {offsets = [0, 0], sizes = [256, 128], strides = [1, 1]} : vector<256x256xf32> to vector<256x128xf32>
      %39 = vector.shape_cast %38 : vector<256x128xf32> to vector<2x128x128xf32>
      %c0_32 = arith.constant 0 : index
      %c0_33 = arith.constant 0 : index
      %c0_34 = arith.constant 0 : index
      %40 = vector.load %arg10[%c0_32, %c0_33, %c0_34] : memref<2x128x128xf32, #tpu.memory_space<vmem>>, vector<2x128x128xf32>
      tpu.vector_store %arg10[%c0_32, %c0_33, %c0_34], %39 {strides = array<i32>} : memref<2x128x128xf32, #tpu.memory_space<vmem>>, vector<2x128x128xf32>,
      %41 = vector.extract_strided_slice %37 {offsets = [0, 128], sizes = [256, 128], strides = [1, 1]} : vector<256x256xf32> to vector<256x128xf32>
      %42 = vector.shape_cast %41 : vector<256x128xf32> to vector<2x128x128xf32>
      %c0_35 = arith.constant 0 : index
      %c0_36 = arith.constant 0 : index
      %c0_37 = arith.constant 0 : index
      %43 = vector.load %arg11[%c0_35, %c0_36, %c0_37] : memref<2x128x128xf32, #tpu.memory_space<vmem>>, vector<2x128x128xf32>
      tpu.vector_store %arg11[%c0_35, %c0_36, %c0_37], %42 {strides = array<i32>} : memref<2x128x128xf32, #tpu.memory_space<vmem>>, vector<2x128x128xf32>,
    } else {
    }
    %c0 = arith.constant 0 : index
    %c0_1 = arith.constant 0 : index
    %c0_2 = arith.constant 0 : index
    %3 = vector.load %arg2[%c0, %c0_1, %c0_2] : memref<2x8x128xf32, #tpu.memory_space<vmem>>, vector<2x8x128xf32>
    %4 = vector.shape_cast %3 : vector<2x8x128xf32> to vector<16x128xf32>
    %c0_3 = arith.constant 0 : index
    %c0_4 = arith.constant 0 : index
    %5 = vector.load %arg4[%c0_3, %c0_4] : memref<128x128xf32, #tpu.memory_space<vmem>>, vector<128x128xf32>
    %cst = arith.constant dense<0.000000e+00> : vector<16x128xf32>
    %6 = tpu.matmul %4, %5, %cst {dimension_numbers = #tpu.dot_dimension_numbers<[1], [0], [0], [1], [0, 0, 1, 1], [], []>} : vector<16x128xf32>, vector<128x128xf32>, vector<16x128xf32> -> vector<16x128xf32>
    %c0_5 = arith.constant 0 : index
    %c0_6 = arith.constant 0 : index
    %7 = vector.load %arg5[%c0_5, %c0_6] : memref<1x128xf32, #tpu.memory_space<vmem>>, vector<1x128xf32>
    %8 = vector.broadcast %7 : vector<1x128xf32> to vector<16x128xf32>
    %9 = arith.addf %6, %8 : vector<16x128xf32>
    %10 = vector.shape_cast %9 : vector<16x128xf32> to vector<2x8x128xf32>
    %c0_7 = arith.constant 0 : index
    %c0_8 = arith.constant 0 : index
    %c0_9 = arith.constant 0 : index
    %11 = vector.load %arg10[%c0_7, %c0_8, %c0_9] : memref<2x128x128xf32, #tpu.memory_space<vmem>>, vector<2x128x128xf32>
    "tpu.trace_start"() <{level = 10 : i32, message = "bqd,bkd->bqk"}> : () -> ()
    %cst_10 = arith.constant dense<0.000000e+00> : vector<2x8x128xf32>
    %12 = tpu.matmul %10, %11, %cst_10 {dimension_numbers = #tpu.dot_dimension_numbers<[2], [2], [1], [1], [0, 0, 0, 1, 1, 1], [0], [0]>} : vector<2x8x128xf32>, vector<2x128x128xf32>, vector<2x8x128xf32> -> vector<2x8x128xf32>
    "tpu.trace_stop"() : () -> ()
    %13 = tpu.iota {dimensions = array<i32: 2>} : vector<2x8x128xi32>
    %c8_i32 = arith.constant 8 : i32
    %14 = vector.broadcast %c8_i32 : i32 to vector<2x8x128xi32>
    %15 = arith.cmpi slt, %13, %14 : vector<2x8x128xi32>
    %cst_11 = arith.constant -1.000000e+30 : f32
    %16 = vector.broadcast %cst_11 : f32 to vector<2x8x128xf32>
    %17 = arith.select %15, %12, %16 : vector<2x8x128xi1>, vector<2x8x128xf32>
    %cst_12 = arith.constant dense<0xFF800000> : vector<2x8xf32>
    %18 = vector.multi_reduction <maximumf>, %17, %cst_12 [2] : vector<2x8x128xf32> to vector<2x8xf32>
    %19 = vector.shape_cast %18 : vector<2x8xf32> to vector<2x8x1xf32>
    %20 = vector.broadcast %19 : vector<2x8x1xf32> to vector<2x8x128xf32>
    %21 = arith.subf %17, %20 : vector<2x8x128xf32>
    %22 = math.exp %21 : vector<2x8x128xf32>
    %cst_13 = arith.constant dense<0.000000e+00> : vector<2x8xf32>
    %23 = vector.multi_reduction <add>, %22, %cst_13 [2] : vector<2x8x128xf32> to vector<2x8xf32>
    %24 = vector.shape_cast %23 : vector<2x8xf32> to vector<2x8x1xf32>
    %25 = vector.broadcast %24 : vector<2x8x1xf32> to vector<2x8x128xf32>
    %26 = arith.divf %22, %25 : vector<2x8x128xf32>
    %c0_14 = arith.constant 0 : index
    %c0_15 = arith.constant 0 : index
    %c0_16 = arith.constant 0 : index
    %27 = vector.load %arg11[%c0_14, %c0_15, %c0_16] : memref<2x128x128xf32, #tpu.memory_space<vmem>>, vector<2x128x128xf32>
    "tpu.trace_start"() <{level = 10 : i32, message = "bqk,bkd->bqd"}> : () -> ()
    %cst_17 = arith.constant dense<0.000000e+00> : vector<2x8x128xf32>
    %28 = tpu.matmul %26, %27, %cst_17 {dimension_numbers = #tpu.dot_dimension_numbers<[2], [1], [1], [2], [0, 0, 0, 1, 1, 2], [0], [0]>} : vector<2x8x128xf32>, vector<2x128x128xf32>, vector<2x8x128xf32> -> vector<2x8x128xf32>
    "tpu.trace_stop"() : () -> ()
    %c0_18 = arith.constant 0 : index
    %c0_19 = arith.constant 0 : index
    %c0_20 = arith.constant 0 : index
    %29 = vector.load %arg8[%c0_18, %c0_19, %c0_20] : memref<2x8x128xf32, #tpu.memory_space<vmem>>, vector<2x8x128xf32>
    tpu.vector_store %arg8[%c0_18, %c0_19, %c0_20], %28 {strides = array<i32>} : memref<2x8x128xf32, #tpu.memory_space<vmem>>, vector<2x8x128xf32>,
    %c0_21 = arith.constant 0 : index
    %c0_22 = arith.constant 0 : index
    %c0_23 = arith.constant 0 : index
    %30 = vector.load %arg9[%c0_21, %c0_22, %c0_23] : memref<2x8x128xf32, #tpu.memory_space<vmem>>, vector<2x8x128xf32>
    tpu.vector_store %arg9[%c0_21, %c0_22, %c0_23], %26 {strides = array<i32>} : memref<2x8x128xf32, #tpu.memory_space<vmem>>, vector<2x8x128xf32>,
    return
  }
  func.func @transform_0(%arg0: i32, %arg1: i32) -> (i32, i32, i32) {
    %c0_i32 = arith.constant 0 : i32
    %c0_i32_0 = arith.constant 0 : i32
    return %arg0, %arg1, %c0_i32 : i32, i32, i32
  }
  func.func @transform_1(%arg0: i32, %arg1: i32) -> (i32, i32, i32) {
    %c0_i32 = arith.constant 0 : i32
    %c0_i32_0 = arith.constant 0 : i32
    %c0_i32_1 = arith.constant 0 : i32
    return %arg0, %c0_i32, %c0_i32_0 : i32, i32, i32
  }
  func.func @transform_2(%arg0: i32, %arg1: i32) -> (i32, i32) {
    %c0_i32 = arith.constant 0 : i32
    %c0_i32_0 = arith.constant 0 : i32
    %c0_i32_1 = arith.constant 0 : i32
    return %c0_i32, %c0_i32_0 : i32, i32
  }
  func.func @transform_3(%arg0: i32, %arg1: i32) -> (i32, i32) {
    %c0_i32 = arith.constant 0 : i32
    %c0_i32_0 = arith.constant 0 : i32
    %c0_i32_1 = arith.constant 0 : i32
    return %c0_i32, %c0_i32_0 : i32, i32
  }
  func.func @transform_4(%arg0: i32, %arg1: i32) -> (i32, i32) {
    %c0_i32 = arith.constant 0 : i32
    %c0_i32_0 = arith.constant 0 : i32
    %c0_i32_1 = arith.constant 0 : i32
    return %c0_i32, %c0_i32_0 : i32, i32
  }
  func.func @transform_5(%arg0: i32, %arg1: i32) -> (i32, i32) {
    %c0_i32 = arith.constant 0 : i32
    %c0_i32_0 = arith.constant 0 : i32
    %c0_i32_1 = arith.constant 0 : i32
    return %c0_i32, %c0_i32_0 : i32, i32
  }
  func.func @transform_6(%arg0: i32, %arg1: i32) -> (i32, i32, i32) {
    %c0_i32 = arith.constant 0 : i32
    %c0_i32_0 = arith.constant 0 : i32
    return %arg0, %arg1, %c0_i32 : i32, i32, i32
  }
  func.func @transform_7(%arg0: i32, %arg1: i32) -> (i32, i32, i32) {
    %c0_i32 = arith.constant 0 : i32
    %c0_i32_0 = arith.constant 0 : i32
    return %arg0, %arg1, %c0_i32 : i32, i32, i32
  }
}

</mosaic_0001>

<bundles_post_ra>
// kernel: tpu_custom_call.1
= control target key start
LH: loop header
LB: loop body
LE: loop exit
PB: predicated region body
PF: predicated region fallthrough
CT: control target
= control target key end

     0   :  { %13 = vsyncpa [#allocation5], 0  ;;  %s2012_s0 = inlined_call_operand.hbm [shape: f32[2,8,128], index: 0, kind: input, shape index: {}]   ;;  %s2013_s1 = inlined_call_operand.hbm [shape: f32[2,128,128], index: 1, kind: input, shape index: {}]   ;;  %s2014_s2 = inlined_call_operand.hbm [shape: f32[128,128], index: 2, kind: input, shape index: {}]   ;;  %s2015_s3 = inlined_call_operand.vmem [shape: f32[1,128], index: 3, kind: input, shape index: {}]   ;;  %s2016_s4 = inlined_call_operand.hbm [shape: f32[128,256], index: 4, kind: input, shape index: {}]   ;;  %s2017_s5 = inlined_call_operand.vmem [shape: f32[1,256], index: 5, kind: input, shape index: {}]   ;;  %s2018_s6 = inlined_call_operand.hbm [shape: f32[2,8,128], index: 6, kind: output, shape index: {0}]   ;;  %s2019_s7 = inlined_call_operand.hbm [shape: f32[2,8,128], index: 7, kind: output, shape index: {1}]  }
   0x1   :  { %14 = vsyncpa [#allocation8], 0 }
   0x2   :  { %15 = vsyncpa [#allocation11], 0 }
   0x3   :  { %16 = vsyncpa [#allocation6], 0 }
   0x4   :  { %17 = vsyncpa [#allocation14], 0  ;;  %s1574_s24 = smov [#allocation7]   ;;  %s1575_s26 = smov [#allocation4]  }
   0x5   :  { %s35_s25 = sshll.u32 %s1574_s24, 4  ;;  %s23_s27 = sshll.u32 %s1575_s26, 4  ;;  %s36_s25 = int_to_ptr.vmem [resolvable:$true] %s35_s25  ;;  %s1627_s27 = int_to_ptr.vmem [resolvable:$true] %s23_s27 }
   0x6   :  { %s1432_s30 = scalar_lea.hbm %s2013_s1, 4096 }
   0x7   :  { %p1433_p0 = scmp.ne.s32.totalorder %s2013_s1, %s1432_s30  ;;  %p1436_p1 = scmp.lt.u32.totalorder %s1432_s30, %s2013_s1 }
   0x9   :  { %p1438_p2 = pnand %p1436_p1, %p1433_p0 }
   0xb   :  { %1441 = shalt.err (!%p1438_p2)
}
   0xc   :  { %s1442_s12 = scalar_lea.vmem %s36_s25, 4096  ;;  %p1447_p4 = scmp.lt.s32.totalorder %s36_s25, %s36_s25 }
   0xd   :  { %p1443_p3 = scmp.ne.s32.totalorder %s36_s25, %s1442_s12  ;;  %p1448_p5 = scmp.lt.s32.totalorder %s1442_s12, %s1442_s12 }
   0xf   :  { %p1449_p6 = por %p1448_p5, %p1447_p4 }
  0x11   :  { %p1450_p7 = pnand %p1449_p6, %p1443_p3 }
  0x13   :  { %1453 = shalt.err (!%p1450_p7)
}
  0x14   :  { %s1576_s13 = smov 128   ;;  %s1577_s14 = smov 8  }
  0x15   :  { %41 = dma.hbm_to_vmem [thread:$0]  %s2013_s1, 4096, %s36_s25, [#allocation8], %s1576_s13, %s1576_s13, %s1577_s14  }
  0x16   :  { %s1454_s19 = scalar_lea.hbm %s2012_s0, 256 }
  0x17   :  { %p1455_p8 = scmp.ne.s32.totalorder %s2012_s0, %s1454_s19  ;;  %p1458_p9 = scmp.lt.u32.totalorder %s1454_s19, %s2012_s0 }
  0x19   :  { %p1460_p10 = pnand %p1458_p9, %p1455_p8 }
  0x1b   :  { %1463 = shalt.err (!%p1460_p10)
}
  0x1c   :  { %s1464_s24 = scalar_lea.vmem %s1627_s27, 256  ;;  %p1469_p12 = scmp.lt.s32.totalorder %s1627_s27, %s1627_s27 }
  0x1d   :  { %p1465_p11 = scmp.ne.s32.totalorder %s1627_s27, %s1464_s24  ;;  %p1470_p13 = scmp.lt.s32.totalorder %s1464_s24, %s1464_s24 }
  0x1f   :  { %p1471_p0 = por %p1470_p13, %p1469_p12 }
  0x21   :  { %p1472_p1 = pnand %p1471_p0, %p1465_p11 }
  0x23   :  { %1475 = shalt.err (!%p1472_p1)
}
  0x24   :  { %29 = dma.hbm_to_vmem [thread:$0]  %s2012_s0, 256, %s1627_s27, [#allocation5], %s1576_s13, %s1576_s13, %s1577_s14  }
  0x25   :  { %s1578_s26 = smov [#allocation9]   ;;  %s1579_s29 = smov [#allocation10]  }
  0x26   :  { %s47_s28 = sshll.u32 %s1578_s26, 4  ;;  %s61_s30 = sshll.u32 %s1579_s29, 4  ;;  %s48_s28 = int_to_ptr.vmem [resolvable:$true] %s47_s28  ;;  %s1664_s30 = int_to_ptr.vmem [resolvable:$true] %s61_s30 }
  0x27   :  { %s1476_s10 = scalar_lea.hbm %s2014_s2, 2048 }
  0x28   :  { %p1477_p2 = scmp.ne.s32.totalorder %s2014_s2, %s1476_s10  ;;  %p1480_p3 = scmp.lt.u32.totalorder %s1476_s10, %s2014_s2 }
  0x2a   :  { %p1482_p4 = pnand %p1480_p3, %p1477_p2 }
  0x2c   :  { %1485 = shalt.err (!%p1482_p4)
}
  0x2d   :  { %s1486_s0 = scalar_lea.vmem %s48_s28, 2048  ;;  %p1491_p6 = scmp.lt.s32.totalorder %s48_s28, %s48_s28 }
  0x2e   :  { %p1487_p5 = scmp.ne.s32.totalorder %s48_s28, %s1486_s0  ;;  %p1492_p7 = scmp.lt.s32.totalorder %s1486_s0, %s1486_s0 }
  0x30   :  { %p1493_p8 = por %p1492_p7, %p1491_p6 }
  0x32   :  { %p1494_p9 = pnand %p1493_p8, %p1487_p5 }
  0x34   :  { %1497 = shalt.err (!%p1494_p9)
}
  0x35   :  { %53 = dma.hbm_to_vmem [thread:$0]  %s2014_s2, 2048, %s48_s28, [#allocation8], %s1576_s13, %s1576_s13, %s1577_s14  }
  0x36   :  { %s1498_s20 = scalar_lea.hbm %s2016_s4, 4096 }
  0x37   :  { %p1499_p10 = scmp.ne.s32.totalorder %s2016_s4, %s1498_s20  ;;  %p1502_p11 = scmp.lt.u32.totalorder %s1498_s20, %s2016_s4 }
  0x39   :  { %p1504_p12 = pnand %p1502_p11, %p1499_p10 }
  0x3b   :  { %1507 = shalt.err (!%p1504_p12)
}
  0x3c   :  { %s1508_s1 = scalar_lea.vmem %s1664_s30, 4096  ;;  %p1513_p0 = scmp.lt.s32.totalorder %s1664_s30, %s1664_s30 }
  0x3d   :  { %p1509_p13 = scmp.ne.s32.totalorder %s1664_s30, %s1508_s1  ;;  %p1514_p1 = scmp.lt.s32.totalorder %s1508_s1, %s1508_s1 }
  0x3f   :  { %p1515_p2 = por %p1514_p1, %p1513_p0 }
  0x41   :  { %p1516_p3 = pnand %p1515_p2, %p1509_p13 }
  0x43   :  { %1519 = shalt.err (!%p1516_p3)
}
  0x44   :  { %s1580_s2 = smov 256   ;;  %s1581_s25 = smov 16  }
  0x45   :  { %67 = dma.hbm_to_vmem [thread:$0]  %s2016_s4, 4096, %s1664_s30, [#allocation11], %s1580_s2, %s1580_s2, %s1581_s25  }
  0x46   :  { %1564 = dma.done.wait [#allocation5], 256  }
  0x47   :  { %1565 = vsyncadd [#allocation5], 4294967040 }
  0x48   :  { %1566 = dma.done.wait [#allocation8], 6144  }
  0x49   :  { %1567 = vsyncadd [#allocation8], 4294961152 }
  0x4a   :  { %1568 = dma.done.wait [#allocation11], 4096  }
  0x4b   :  { %1569 = vsyncadd [#allocation11], 4294963200  ;;  %v1582_v0 = vmov 0.0   ;;  %v119_v1 = vld [vmem:[#allocation10 + $0x8] sm:$0xff]  ;;  %v121_v2 = vld [vmem:[#allocation10 + $0x18] sm:$0xff]  ;;  %vm1584_vm0 = vmmov 0  }
  0x4c   :  { %226 = vmatprep.mubr.f32.mxu0 %v1582_v0  ;;  %v118_v3 = vld [vmem:[#allocation10] sm:$0xff]  ;;  %v1251_v4 = vpack.c.bf16 %v121_v2, %v119_v1  ;;  %v120_v5 = vld [vmem:[#allocation10 + $0x10] sm:$0xff]  ;;  %v123_v6 = vld [vmem:[#allocation10 + $0x28] sm:$0xff] }
  0x4d   :  { %v125_v7 = vld [vmem:[#allocation10 + $0x38] sm:$0xff]  ;;  %v1253_v8 = vpack.c.bf16 %v120_v5, %v118_v3  ;;  %v122_v10 = vld [vmem:[#allocation10 + $0x20] sm:$0xff]  ;;  %v124_v11 = vld [vmem:[#allocation10 + $0x30] sm:$0xff] }
  0x4e   :  { %v1255_v9 = vpack.c.bf16 %v125_v7, %v123_v6  ;;  %v127_v12 = vld [vmem:[#allocation10 + $0x48] sm:$0xff]  ;;  %1252 = vmatprep.subr.bf16.mxu0 %v1251_v4  ;;  %v129_v13 = vld [vmem:[#allocation10 + $0x58] sm:$0xff]  ;;  %v1257_v14 = vpack.c.bf16 %v124_v11, %v122_v10  ;;  %v126_v16 = vld [vmem:[#allocation10 + $0x40] sm:$0xff] }
  0x4f   :  { %1254 = vmatpush1.bf16.msra.mxu0 %v1253_v8  ;;  %v1259_v15 = vpack.c.bf16 %v129_v13, %v127_v12  ;;  %v128_v17 = vld [vmem:[#allocation10 + $0x50] sm:$0xff]  ;;  %v131_v18 = vld [vmem:[#allocation10 + $0x68] sm:$0xff]  ;;  %v133_v19 = vld [vmem:[#allocation10 + $0x78] sm:$0xff] }
  0x50   :  { %1256 = vmatprep.subr.bf16.mxu0 %v1255_v9  ;;  %v1261_v20 = vpack.c.bf16 %v128_v17, %v126_v16  ;;  %v1263_v21 = vpack.c.bf16 %v133_v19, %v131_v18  ;;  %v130_v22 = vld [vmem:[#allocation10 + $0x60] sm:$0xff]  ;;  %v132_v23 = vld [vmem:[#allocation10 + $0x70] sm:$0xff]  ;;  %v135_v24 = vld [vmem:[#allocation10 + $0x88] sm:$0xff] }
  0x51   :  { %v137_v25 = vld [vmem:[#allocation10 + $0x98] sm:$0xff]  ;;  %v1265_v26 = vpack.c.bf16 %v132_v23, %v130_v22  ;;  %v134_v28 = vld [vmem:[#allocation10 + $0x80] sm:$0xff]  ;;  %v136_v29 = vld [vmem:[#allocation10 + $0x90] sm:$0xff] }
  0x52   :  { %v1267_v27 = vpack.c.bf16 %v137_v25, %v135_v24  ;;  %v139_v30 = vld [vmem:[#allocation10 + $0xa8] sm:$0xff]  ;;  %v141_v31 = vld [vmem:[#allocation10 + $0xb8] sm:$0xff]  ;;  %v485_v32 = vld [vmem:[#allocation9] sm:$0xff]  ;;  %v1269_v37 = vpack.c.bf16 %v136_v29, %v134_v28 }
  0x53   :  { %1258 = vmatpush1.bf16.msra.mxu0 %v1257_v14  ;;  %v486_v33 = vld [vmem:[#allocation9 + $0x8] sm:$0xff]  ;;  %v487_v35 = vld [vmem:[#allocation9 + $0x10] sm:$0xff]  ;;  %v488_v36 = vld [vmem:[#allocation9 + $0x18] sm:$0xff]  ;;  %v1271_v41 = vpack.c.bf16 %v141_v31, %v139_v30 }
  0x54   :  { %1260 = vmatprep.subr.bf16.mxu0 %v1259_v15  ;;  %v1283_v34 = vpack.c.bf16 %v486_v33, %v485_v32  ;;  %v1287_v38 = vpack.c.bf16 %v488_v36, %v487_v35  ;;  %v489_v39 = vld [vmem:[#allocation9 + $0x20] sm:$0xff]  ;;  %v490_v40 = vld [vmem:[#allocation9 + $0x28] sm:$0xff]  ;;  %v140_v43 = vld [vmem:[#allocation10 + $0xb0] sm:$0xff]  ;;  %v152_v32 = vlaneseq }
  0x55   :  { %v138_v42 = vld [vmem:[#allocation10 + $0xa0] sm:$0xff]  ;;  %v143_v44 = vld [vmem:[#allocation10 + $0xc8] sm:$0xff]  ;;  %v145_v45 = vld [vmem:[#allocation10 + $0xd8] sm:$0xff]  ;;  %v1291_v46 = vpack.c.bf16 %v490_v40, %v489_v39 }
  0x56   :  { %1284 = vmatprep.subr.bf16.mxu1 %v1283_v34  ;;  %v1273_v47 = vpack.c.bf16 %v140_v43, %v138_v42  ;;  %v491_v48 = vld [vmem:[#allocation9 + $0x30] sm:$0xff]  ;;  %v492_v49 = vld [vmem:[#allocation9 + $0x38] sm:$0xff]  ;;  %v1275_v50 = vpack.c.bf16 %v145_v45, %v143_v44  ;;  %v142_v51 = vld [vmem:[#allocation10 + $0xc0] sm:$0xff] }
  0x57   :  { %1262 = vmatpush1.bf16.msra.mxu0 %v1261_v20  ;;  %1286 = vmatpush3.bf16.msra.mxu1 %v1283_v34  ;;  %v144_v52 = vld [vmem:[#allocation10 + $0xd0] sm:$0xff]  ;;  %v147_v54 = vld [vmem:[#allocation10 + $0xe8] sm:$0xff]  ;;  %v149_v55 = vld [vmem:[#allocation10 + $0xf8] sm:$0xff]  ;;  %v1295_v56 = vpack.c.bf16 %v492_v49, %v491_v48  ;;  %v153_v34 = vshrl.u32 %v152_v32, 7 }
  0x58   :  { %1264 = vmatprep.subr.bf16.mxu0 %v1263_v21  ;;  %1288 = vmatprep.subr.bf16.mxu1 %v1287_v38  ;;  %v483_v53 = vld [vmem:[#allocation4] sm:$0xff]  ;;  %v1277_v57 = vpack.c.bf16 %v144_v52, %v142_v51  ;;  %v493_v58 = vld [vmem:[#allocation9 + $0x40] sm:$0xff]  ;;  %v494_v59 = vld [vmem:[#allocation9 + $0x48] sm:$0xff]  ;;  %v1279_v60 = vpack.c.bf16 %v149_v55, %v147_v54 }
  0x59   :  { %1108 = vmatprep.mubr.f32.mxu1 %v483_v53  ;;  %v146_v61 = vld [vmem:[#allocation10 + $0xe0] sm:$0xff]  ;;  %v148_v62 = vld [vmem:[#allocation10 + $0xf0] sm:$0xff]  ;;  %v1299_v63 = vpack.c.bf16 %v494_v59, %v493_v58  ;;  %v496_v3 = vld [vmem:[#allocation9 + $0x58] sm:$0xff] }
  0x5a   :  { %v1281_v1 = vpack.c.bf16 %v148_v62, %v146_v61  ;;  %v495_v2 = vld [vmem:[#allocation9 + $0x50] sm:$0xff]  ;;  %v86_v5 = vld [vmem:[#allocation7] sm:$0xff]  ;;  %v498_v7 = vld [vmem:[#allocation9 + $0x68] sm:$0xff] }
  0x5b   :  { %1266 = vmatpush1.bf16.msra.mxu0 %v1265_v26  ;;  %1290 = vmatpush3.bf16.msra.mxu1 %v1287_v38  ;;  %v1303_v4 = vpack.c.bf16 %v496_v3, %v495_v2  ;;  %v497_v6 = vld [vmem:[#allocation9 + $0x60] sm:$0xff]  ;;  %v87_v9 = vld [vmem:[#allocation7 + $0x8] sm:$0xff]  ;;  %v499_v10 = vld [vmem:[#allocation9 + $0x70] sm:$0xff] }
  0x5c   :  { %1268 = vmatprep.subr.bf16.mxu0 %v1267_v27  ;;  %1292 = vmatprep.subr.bf16.mxu1 %v1291_v46  ;;  %v1307_v8 = vpack.c.bf16 %v498_v7, %v497_v6  ;;  %v500_v11 = vld [vmem:[#allocation9 + $0x78] sm:$0xff]  ;;  %v88_v13 = vld [vmem:[#allocation7 + $0x10] sm:$0xff]  ;;  %v90_v16 = vld [vmem:[#allocation7 + $0x20] sm:$0xff] }
  0x5d   :  { %v1311_v12 = vpack.c.bf16 %v500_v11, %v499_v10  ;;  %v89_v14 = vld [vmem:[#allocation7 + $0x18] sm:$0xff]  ;;  %v91_v17 = vld [vmem:[#allocation7 + $0x28] sm:$0xff]  ;;  %v92_v18 = vld [vmem:[#allocation7 + $0x30] sm:$0xff] }
  0x5e   :  { %v484_v15 = vld [vmem:[#allocation4 + $0x8] sm:$0xff]  ;;  %v94_v20 = vld [vmem:[#allocation7 + $0x40] sm:$0xff]  ;;  %v95_v21 = vld [vmem:[#allocation7 + $0x48] sm:$0xff] }
  0x5f   :  { %1270 = vmatpush1.bf16.msra.mxu0 %v1269_v37  ;;  %1294 = vmatpush3.bf16.msra.mxu1 %v1291_v46  ;;  %v93_v19 = vld [vmem:[#allocation7 + $0x38] sm:$0xff]  ;;  %v96_v22 = vld [vmem:[#allocation7 + $0x50] sm:$0xff]  ;;  %v98_v24 = vld [vmem:[#allocation7 + $0x60] sm:$0xff]  ;;  %v158_v37 = vsub.s32 1, %v153_v34 }
  0x60   :  { %1272 = vmatprep.subr.bf16.mxu0 %v1271_v41  ;;  %1296 = vmatprep.subr.bf16.mxu1 %v1295_v56  ;;  %v97_v23 = vld [vmem:[#allocation7 + $0x58] sm:$0xff]  ;;  %v99_v25 = vld [vmem:[#allocation7 + $0x68] sm:$0xff]  ;;  %v100_v26 = vld [vmem:[#allocation7 + $0x70] sm:$0xff]  ;;  %v1583_v41 = vmov 0.0|0.0  }
  0x61   :  { %v101_v27 = vld [vmem:[#allocation7 + $0x78] sm:$0xff]  ;;  %v102_v28 = vld [vmem:[#allocation7 + $0x80] sm:$0xff]  ;;  %v103_v29 = vld [vmem:[#allocation7 + $0x88] sm:$0xff] }
  0x62   :  { %v104_v30 = vld [vmem:[#allocation7 + $0x90] sm:$0xff]  ;;  %v105_v31 = vld [vmem:[#allocation7 + $0x98] sm:$0xff]  ;;  %v106_v33 = vld [vmem:[#allocation7 + $0xa0] sm:$0xff] }
  0x63   :  { %1274 = vmatpush1.bf16.msra.mxu0 %v1273_v47  ;;  %1298 = vmatpush3.bf16.msra.mxu1 %v1295_v56  ;;  %v150_v35 = vld [vmem:[%s2017_s5] sm:$0x3]  ;;  %v107_v36 = vld [vmem:[#allocation7 + $0xa8] sm:$0xff]  ;;  %v109_v40 = vld [vmem:[#allocation7 + $0xb8] sm:$0xff] }
  0x64   :  { %1276 = vmatprep.subr.bf16.mxu0 %v1275_v50  ;;  %1300 = vmatprep.subr.bf16.mxu1 %v1299_v63  ;;  %v1724_v38 = vrot.slane %v150_v35, %v158_v37  ;;  %v108_v39 = vld [vmem:[#allocation7 + $0xb0] sm:$0xff]  ;;  %v110_v42 = vld [vmem:[#allocation7 + $0xc0] sm:$0xff]  ;;  %v111_v43 = vld [vmem:[#allocation7 + $0xc8] sm:$0xff]  ;;  %v154_v50 = vsub.s32 0, %v153_v34 }
  0x65   :  { %v112_v44 = vld [vmem:[#allocation7 + $0xd0] sm:$0xff]  ;;  %v113_v45 = vld [vmem:[#allocation7 + $0xd8] sm:$0xff]  ;;  %v114_v46 = vld [vmem:[#allocation7 + $0xe0] sm:$0xff] }
  0x66   :  { %v115_v47 = vld [vmem:[#allocation7 + $0xe8] sm:$0xff]  ;;  %v116_v48 = vld [vmem:[#allocation7 + $0xf0] sm:$0xff]  ;;  %v117_v49 = vld [vmem:[#allocation7 + $0xf8] sm:$0xff]  ;;  %v1742_v52 = vrot.slane %v150_v35, %v154_v50 }
  0x67   :  { %1278 = vmatpush1.bf16.msra.mxu0 %v1277_v57  ;;  %1302 = vmatpush3.bf16.msra.mxu1 %v1299_v63 }
  0x68   :  { %1280 = vmatprep.subr.bf16.mxu0 %v1279_v60  ;;  %1304 = vmatprep.subr.bf16.mxu1 %v1303_v4 }
  0x6b   :  { %1282 = vmatpush1.bf16.msra.mxu0 %v1281_v1  ;;  %1306 = vmatpush3.bf16.msra.mxu1 %v1303_v4 }
  0x6c   :  { %1308 = vmatprep.subr.bf16.mxu1 %v1307_v8  ;;  %1339 = vmatprep.subr.bf16.mxu0 %v1583_v41 }
  0x6e   :  { %227 = vmatmul.mubr.f32.vlgmr.msra.gmra.mrb[0].mxu0 %v86_v5 }
  0x6f   :  { %232 = vmatprep.mubr.f32.mxu0 %v1582_v0  ;;  %1310 = vmatpush3.bf16.msra.mxu1 %v1307_v8  ;;  %v1766_v8 = vld [vmem:[%s2015_s3] ss:$0 sm:$0xff]  ;;  %s1585_s3 = smov [#allocation13]  }
  0x70   :  { %1312 = vmatprep.subr.bf16.mxu1 %v1311_v12  ;;  %s971_s8 = sshll.u32 %s1585_s3, 4  ;;  %s972_s8 = int_to_ptr.vmem [resolvable:$true] %s971_s8 }
  0x71   :  { %s1520_s9 = scalar_lea.vmem %s972_s8, 256  ;;  %p1525_p5 = scmp.lt.s32.totalorder %s972_s8, %s972_s8 }
  0x72   :  { %233 = vmatmul.mubr.f32.gmra.mrb[2].mxu0 %v87_v9  ;;  %p1521_p4 = scmp.ne.s32.totalorder %s972_s8, %s1520_s9  ;;  %p1526_p6 = scmp.lt.s32.totalorder %s1520_s9, %s1520_s9 }
  0x73   :  { %238 = vmatprep.mubr.f32.mxu0 %v1582_v0  ;;  %1314 = vmatpush3.bf16.msra.mxu1 %v1311_v12 }
  0x74   :  { %1315 = vmatprep.subr.bf16.mxu1 %v1583_v41  ;;  %p1527_p7 = por %p1526_p6, %p1525_p5 }
  0x76   :  { %239 = vmatmul.mubr.f32.gmra.mrb[4].mxu0 %v88_v13  ;;  %1109 = vmatmul.mubr.f32.vlgmr.msra.gmra.mrb[0].mxu1 %v484_v15  ;;  %p1528_p8 = pnand %p1527_p7, %p1521_p4 }
  0x77   :  { %244 = vmatprep.mubr.f32.mxu0 %v1582_v0  ;;  %1143 = vmatprep.mubr.msk.f32.mxu1 %vm1584_vm0, %v1582_v0 }
  0x7a   :  { %245 = vmatmul.mubr.f32.gmra.mrb[6].mxu0 %v89_v14 }
  0x7b   :  { %250 = vmatprep.mubr.f32.mxu0 %v1582_v0 }
  0x7e   :  { %251 = vmatmul.mubr.f32.gmra.mrb[8].mxu0 %v90_v16 }
  0x7f   :  { %256 = vmatprep.mubr.f32.mxu0 %v1582_v0 }
  0x82   :  { %257 = vmatmul.mubr.f32.gmra.mrb[10].mxu0 %v91_v17 }
  0x83   :  { %262 = vmatprep.mubr.f32.mxu0 %v1582_v0 }
  0x86   :  { %263 = vmatmul.mubr.f32.gmra.mrb[12].mxu0 %v92_v18 }
  0x87   :  { %268 = vmatprep.mubr.f32.mxu0 %v1582_v0 }
  0x8a   :  { %269 = vmatmul.mubr.f32.gmra.mrb[14].mxu0 %v93_v19 }
  0x8b   :  { %274 = vmatprep.mubr.f32.mxu0 %v1582_v0 }
  0x8e   :  { %275 = vmatmul.mubr.f32.gmra.mrb[16].mxu0 %v94_v20 }
  0x8f   :  { %280 = vmatprep.mubr.f32.mxu0 %v1582_v0 }
  0x92   :  { %281 = vmatmul.mubr.f32.gmra.mrb[18].mxu0 %v95_v21 }
  0x93   :  { %286 = vmatprep.mubr.f32.mxu0 %v1582_v0 }
  0x96   :  { %287 = vmatmul.mubr.f32.gmra.mrb[20].mxu0 %v96_v22 }
  0x97   :  { %292 = vmatprep.mubr.f32.mxu0 %v1582_v0 }
  0x9a   :  { %293 = vmatmul.mubr.f32.gmra.mrb[22].mxu0 %v97_v23 }
  0x9b   :  { %298 = vmatprep.mubr.f32.mxu0 %v1582_v0 }
  0x9e   :  { %299 = vmatmul.mubr.f32.gmra.mrb[24].mxu0 %v98_v24 }
  0x9f   :  { %304 = vmatprep.mubr.f32.mxu0 %v1582_v0 }
  0xa2   :  { %305 = vmatmul.mubr.f32.gmra.mrb[26].mxu0 %v99_v25 }
  0xa3   :  { %310 = vmatprep.mubr.f32.mxu0 %v1582_v0 }
  0xa6   :  { %311 = vmatmul.mubr.f32.gmra.mrb[28].mxu0 %v100_v26 }
  0xa7   :  { %316 = vmatprep.mubr.f32.mxu0 %v1582_v0 }
  0xaa   :  { %317 = vmatmul.mubr.f32.gmra.mrb[30].mxu0 %v101_v27 }
  0xab   :  { %322 = vmatprep.mubr.f32.mxu0 %v1582_v0 }
  0xae   :  { %323 = vmatmul.mubr.f32.gmra.mrb[32].mxu0 %v102_v28 }
  0xaf   :  { %328 = vmatprep.mubr.f32.mxu0 %v1582_v0 }
  0xb2   :  { %329 = vmatmul.mubr.f32.gmra.mrb[34].mxu0 %v103_v29 }
  0xb3   :  { %334 = vmatprep.mubr.f32.mxu0 %v1582_v0 }
  0xb6   :  { %335 = vmatmul.mubr.f32.gmra.mrb[36].mxu0 %v104_v30 }
  0xb7   :  { %340 = vmatprep.mubr.f32.mxu0 %v1582_v0 }
  0xba   :  { %341 = vmatmul.mubr.f32.gmra.mrb[38].mxu0 %v105_v31 }
  0xbb   :  { %346 = vmatprep.mubr.f32.mxu0 %v1582_v0 }
  0xbe   :  { %347 = vmatmul.mubr.f32.gmra.mrb[40].mxu0 %v106_v33 }
  0xbf   :  { %352 = vmatprep.mubr.f32.mxu0 %v1582_v0 }
  0xc2   :  { %353 = vmatmul.mubr.f32.gmra.mrb[42].mxu0 %v107_v36 }
  0xc3   :  { %358 = vmatprep.mubr.f32.mxu0 %v1582_v0 }
  0xc6   :  { %359 = vmatmul.mubr.f32.gmra.mrb[44].mxu0 %v108_v39 }
  0xc7   :  { %364 = vmatprep.mubr.f32.mxu0 %v1582_v0 }
  0xca   :  { %365 = vmatmul.mubr.f32.gmra.mrb[46].mxu0 %v109_v40 }
  0xcb   :  { %370 = vmatprep.mubr.f32.mxu0 %v1582_v0 }
  0xce   :  { %371 = vmatmul.mubr.f32.gmra.mrb[48].mxu0 %v110_v42 }
  0xcf   :  { %376 = vmatprep.mubr.f32.mxu0 %v1582_v0 }
  0xd2   :  { %377 = vmatmul.mubr.f32.gmra.mrb[50].mxu0 %v111_v43 }
  0xd3   :  { %382 = vmatprep.mubr.f32.mxu0 %v1582_v0 }
  0xd6   :  { %383 = vmatmul.mubr.f32.gmra.mrb[52].mxu0 %v112_v44 }
  0xd7   :  { %388 = vmatprep.mubr.f32.mxu0 %v1582_v0 }
  0xda   :  { %389 = vmatmul.mubr.f32.gmra.mrb[54].mxu0 %v113_v45 }
  0xdb   :  { %394 = vmatprep.mubr.f32.mxu0 %v1582_v0 }
  0xde   :  { %395 = vmatmul.mubr.f32.gmra.mrb[56].mxu0 %v114_v46 }
  0xdf   :  { %400 = vmatprep.mubr.f32.mxu0 %v1582_v0 }
  0xe2   :  { %401 = vmatmul.mubr.f32.gmra.mrb[58].mxu0 %v115_v47 }
  0xe3   :  { %406 = vmatprep.mubr.f32.mxu0 %v1582_v0 }
  0xe6   :  { %407 = vmatmul.mubr.f32.gmra.mrb[60].mxu0 %v116_v48 }
  0xe7   :  { %412 = vmatprep.mubr.f32.mxu0 %v1582_v0 }
  0xea   :  { %413 = vmatmul.mubr.f32.gmra.mrb[62].mxu0 %v117_v49 }
  0xeb   :  { %1178 = vmatprep.mubr.msk.f32.mxu0 %vm1584_vm0, %v1582_v0 }
 0x141   :  { %v228_v51 = vpop.f32.mrb[0].mxu0 }
 0x142   :  { %v230_v53 = vpop.f32.mrb[1].mxu0  ;;  %v229_v55 = vadd.f32 %v228_v51, %v1742_v52 }
 0x143   :  { %v1747_v58 = vadd.f32 %v230_v53, %v1724_v38 }
 0x145   :  { %v234_v54 = vpop.f32.mrb[2].mxu0 }
 0x146   :  { %v235_v56 = vadd.f32 %v234_v54, %v1742_v52  ;;  %v236_v57 = vpop.f32.mrb[3].mxu0 }
 0x147   :  { %v1750_v59 = vadd.f32 %v236_v57, %v1724_v38 }
 0x148   :  { %v1316_v60 = vpack.c.bf16 %v235_v56, %v229_v55 }
 0x149   :  { %v1364_v61 = vpack.c.bf16 %v1750_v59, %v1747_v58  ;;  %v240_v62 = vpop.f32.mrb[4].mxu0  ;;  %v1110_v7 = vpop.f32.mrb[0].mxu1 }
 0x14a   :  { %v242_v63 = vpop.f32.mrb[5].mxu0  ;;  %1317 = vmatpush3.bf16.xpose.msra.mxu1 %v1316_v60  ;;  %v241_v2 = vadd.f32 %v240_v62, %v1742_v52  ;;  %v1769_v10 = vadd.f32 %v1110_v7, %v1766_v8  ;;  %v1771_v11 = vpop.f32.mrb[1].mxu1 }
 0x14b   :  { %1318 = vmatprep.subr.bf16.mxu1 %v1583_v41  ;;  %v1758_v5 = vadd.f32 %v242_v63, %v1724_v38 }
 0x14d   :  { %v246_v1 = vpop.f32.mrb[6].mxu0 }
 0x14e   :  { %v247_v3 = vadd.f32 %v246_v1, %v1742_v52  ;;  %v248_v4 = vpop.f32.mrb[7].mxu0 }
 0x14f   :  { %v1761_v6 = vadd.f32 %v248_v4, %v1724_v38 }
 0x150   :  { %v1319_v9 = vpack.c.bf16 %v247_v3, %v241_v2 }
 0x151   :  { %v1367_v12 = vpack.c.bf16 %v1761_v6, %v1758_v5  ;;  %v252_v13 = vpop.f32.mrb[8].mxu0 }
 0x152   :  { %v254_v14 = vpop.f32.mrb[9].mxu0  ;;  %1320 = vmatpush3.bf16.xpose.msra.mxu1 %v1319_v9  ;;  %v253_v16 = vadd.f32 %v252_v13, %v1742_v52 }
 0x153   :  { %1321 = vmatprep.subr.bf16.mxu1 %v1583_v41  ;;  %v1779_v19 = vadd.f32 %v254_v14, %v1724_v38 }
 0x155   :  { %v258_v15 = vpop.f32.mrb[10].mxu0 }
 0x156   :  { %v259_v17 = vadd.f32 %v258_v15, %v1742_v52  ;;  %v260_v18 = vpop.f32.mrb[11].mxu0 }
 0x157   :  { %v1782_v20 = vadd.f32 %v260_v18, %v1724_v38 }
 0x158   :  { %v1322_v21 = vpack.c.bf16 %v259_v17, %v253_v16 }
 0x159   :  { %v1370_v22 = vpack.c.bf16 %v1782_v20, %v1779_v19  ;;  %v264_v23 = vpop.f32.mrb[12].mxu0 }
 0x15a   :  { %v266_v24 = vpop.f32.mrb[13].mxu0  ;;  %1323 = vmatpush3.bf16.xpose.msra.mxu1 %v1322_v21  ;;  %v265_v26 = vadd.f32 %v264_v23, %v1742_v52 }
 0x15b   :  { %1324 = vmatprep.subr.bf16.mxu1 %v1583_v41  ;;  %v1790_v29 = vadd.f32 %v266_v24, %v1724_v38 }
 0x15d   :  { %v270_v25 = vpop.f32.mrb[14].mxu0 }
 0x15e   :  { %v271_v27 = vadd.f32 %v270_v25, %v1742_v52  ;;  %v272_v28 = vpop.f32.mrb[15].mxu0 }
 0x15f   :  { %v1793_v30 = vadd.f32 %v272_v28, %v1724_v38 }
 0x160   :  { %v1325_v31 = vpack.c.bf16 %v271_v27, %v265_v26 }
 0x161   :  { %v1373_v33 = vpack.c.bf16 %v1793_v30, %v1790_v29  ;;  %v276_v34 = vpop.f32.mrb[16].mxu0 }
 0x162   :  { %v278_v35 = vpop.f32.mrb[17].mxu0  ;;  %1326 = vmatpush3.bf16.xpose.msra.mxu1 %v1325_v31  ;;  %v277_v37 = vadd.f32 %v276_v34, %v1742_v52  ;;  %v575_v31 = vadd.f32 %v1766_v8, %v1771_v11 }
 0x163   :  { %1327 = vmatprep.subr.bf16.mxu1 %v1583_v41  ;;  %v1801_v42 = vadd.f32 %v278_v35, %v1724_v38 }
 0x165   :  { %v282_v36 = vpop.f32.mrb[18].mxu0 }
 0x166   :  { %v283_v39 = vadd.f32 %v282_v36, %v1742_v52  ;;  %v284_v40 = vpop.f32.mrb[19].mxu0 }
 0x167   :  { %v1804_v43 = vadd.f32 %v284_v40, %v1724_v38 }
 0x168   :  { %v1328_v44 = vpack.c.bf16 %v283_v39, %v277_v37 }
 0x169   :  { %v1376_v45 = vpack.c.bf16 %v1804_v43, %v1801_v42  ;;  %v288_v46 = vpop.f32.mrb[20].mxu0 }
 0x16a   :  { %v290_v47 = vpop.f32.mrb[21].mxu0  ;;  %1329 = vmatpush3.bf16.xpose.msra.mxu1 %v1328_v44  ;;  %v289_v49 = vadd.f32 %v288_v46, %v1742_v52 }
 0x16b   :  { %1330 = vmatprep.subr.bf16.mxu1 %v1583_v41  ;;  %v1812_v53 = vadd.f32 %v290_v47, %v1724_v38 }
 0x16d   :  { %v294_v48 = vpop.f32.mrb[22].mxu0 }
 0x16e   :  { %v295_v50 = vadd.f32 %v294_v48, %v1742_v52  ;;  %v296_v51 = vpop.f32.mrb[23].mxu0 }
 0x16f   :  { %v1815_v54 = vadd.f32 %v296_v51, %v1724_v38 }
 0x170   :  { %v1331_v55 = vpack.c.bf16 %v295_v50, %v289_v49 }
 0x171   :  { %v1379_v56 = vpack.c.bf16 %v1815_v54, %v1812_v53  ;;  %v300_v57 = vpop.f32.mrb[24].mxu0 }
 0x172   :  { %v302_v60 = vpop.f32.mrb[25].mxu0  ;;  %1332 = vmatpush3.bf16.xpose.msra.mxu1 %v1331_v55  ;;  %v301_v63 = vadd.f32 %v300_v57, %v1742_v52 }
 0x173   :  { %1333 = vmatprep.subr.bf16.mxu1 %v1583_v41  ;;  %v1823_v3 = vadd.f32 %v302_v60, %v1724_v38 }
 0x175   :  { %v306_v62 = vpop.f32.mrb[26].mxu0 }
 0x176   :  { %v307_v1 = vadd.f32 %v306_v62, %v1742_v52  ;;  %v308_v2 = vpop.f32.mrb[27].mxu0 }
 0x177   :  { %v1826_v4 = vadd.f32 %v308_v2, %v1724_v38 }
 0x178   :  { %v1334_v7 = vpack.c.bf16 %v307_v1, %v301_v63 }
 0x179   :  { %v1382_v9 = vpack.c.bf16 %v1826_v4, %v1823_v3  ;;  %v312_v13 = vpop.f32.mrb[28].mxu0 }
 0x17a   :  { %v314_v14 = vpop.f32.mrb[29].mxu0  ;;  %1335 = vmatpush3.bf16.xpose.msra.mxu1 %v1334_v7  ;;  %v313_v16 = vadd.f32 %v312_v13, %v1742_v52 }
 0x17b   :  { %1336 = vmatprep.subr.bf16.mxu1 %v1583_v41  ;;  %v1834_v21 = vadd.f32 %v314_v14, %v1724_v38 }
 0x17d   :  { %v318_v15 = vpop.f32.mrb[30].mxu0 }
 0x17e   :  { %v319_v17 = vadd.f32 %v318_v15, %v1742_v52  ;;  %v320_v18 = vpop.f32.mrb[31].mxu0 }
 0x17f   :  { %v1837_v23 = vadd.f32 %v320_v18, %v1724_v38 }
 0x180   :  { %v1337_v24 = vpack.c.bf16 %v319_v17, %v313_v16 }
 0x181   :  { %v1385_v25 = vpack.c.bf16 %v1837_v23, %v1834_v21  ;;  %v324_v26 = vpop.f32.mrb[32].mxu0 }
 0x182   :  { %v326_v27 = vpop.f32.mrb[33].mxu0  ;;  %1338 = vmatpush3.bf16.xpose.msra.mxu1 %v1337_v24  ;;  %v325_v34 = vadd.f32 %v324_v26, %v1742_v52 }
 0x183   :  { %1363 = vmatprep.subr.bf16.mxu1 %v1583_v41  ;;  %v1847_v37 = vadd.f32 %v326_v27, %v1724_v38 }
 0x185   :  { %v330_v28 = vpop.f32.mrb[34].mxu0 }
 0x186   :  { %v331_v35 = vadd.f32 %v330_v28, %v1742_v52  ;;  %v332_v36 = vpop.f32.mrb[35].mxu0 }
 0x187   :  { %v1850_v39 = vadd.f32 %v332_v36, %v1724_v38 }
 0x188   :  { %v1340_v40 = vpack.c.bf16 %v331_v35, %v325_v34 }
 0x189   :  { %v1388_v44 = vpack.c.bf16 %v1850_v39, %v1847_v37  ;;  %1144 = vmatmul.mubr.f32.vlgmr.msra.gmra.mrb[2].mxu1 %v575_v31  ;;  %v336_v46 = vpop.f32.mrb[36].mxu0 }
 0x18a   :  { %1341 = vmatpush3.bf16.xpose.msra.mxu0 %v1340_v40  ;;  %1365 = vmatpush3.bf16.msra.mxu1 %v1364_v61  ;;  %v338_v8 = vpop.f32.mrb[37].mxu0  ;;  %v337_v47 = vadd.f32 %v336_v46, %v1742_v52 }
 0x18b   :  { %1366 = vmatprep.subr.bf16.mxu1 %v1583_v41  ;;  %1342 = vmatprep.subr.bf16.mxu0 %v1583_v41  ;;  %v1867_v58 = vadd.f32 %v338_v8, %v1724_v38 }
 0x18c   :  { %1213 = vmatprep.mubr.msk.f32.mxu1 %vm1584_vm0, %v1582_v0 }
 0x18d   :  { %v342_v11 = vpop.f32.mrb[38].mxu0 }
 0x18e   :  { %v343_v48 = vadd.f32 %v342_v11, %v1742_v52  ;;  %1368 = vmatpush3.bf16.msra.mxu1 %v1367_v12  ;;  %v344_v49 = vpop.f32.mrb[39].mxu0 }
 0x18f   :  { %v1870_v59 = vadd.f32 %v344_v49, %v1724_v38  ;;  %1369 = vmatprep.subr.bf16.mxu1 %v1583_v41 }
 0x190   :  { %v1343_v61 = vpack.c.bf16 %v343_v48, %v337_v47 }
 0x191   :  { %v1391_v50 = vpack.c.bf16 %v1870_v59, %v1867_v58  ;;  %v348_v51 = vpop.f32.mrb[40].mxu0 }
 0x192   :  { %1344 = vmatpush3.bf16.xpose.msra.mxu0 %v1343_v61  ;;  %1371 = vmatpush3.bf16.msra.mxu1 %v1370_v22  ;;  %v350_v5 = vpop.f32.mrb[41].mxu0  ;;  %v349_v12 = vadd.f32 %v348_v51, %v1742_v52 }
 0x193   :  { %1372 = vmatprep.subr.bf16.mxu1 %v1583_v41  ;;  %1345 = vmatprep.subr.bf16.mxu0 %v1583_v41  ;;  %v1886_v60 = vadd.f32 %v350_v5, %v1724_v38 }
 0x195   :  { %v354_v6 = vpop.f32.mrb[42].mxu0 }
 0x196   :  { %v355_v55 = vadd.f32 %v354_v6, %v1742_v52  ;;  %1374 = vmatpush3.bf16.msra.mxu1 %v1373_v33  ;;  %v356_v57 = vpop.f32.mrb[43].mxu0 }
 0x197   :  { %1375 = vmatprep.subr.bf16.mxu1 %v1583_v41  ;;  %v1890_v19 = vadd.f32 %v356_v57, %v1724_v38 }
 0x198   :  { %v1346_v20 = vpack.c.bf16 %v355_v55, %v349_v12 }
 0x199   :  { %v1394_v22 = vpack.c.bf16 %v1890_v19, %v1886_v60  ;;  %v360_v62 = vpop.f32.mrb[44].mxu0 }
 0x19a   :  { %1347 = vmatpush3.bf16.xpose.msra.mxu0 %v1346_v20  ;;  %1377 = vmatpush3.bf16.msra.mxu1 %v1376_v45  ;;  %v362_v29 = vpop.f32.mrb[45].mxu0  ;;  %v361_v33 = vadd.f32 %v360_v62, %v1742_v52 }
 0x19b   :  { %1378 = vmatprep.subr.bf16.mxu1 %v1583_v41  ;;  %1348 = vmatprep.subr.bf16.mxu0 %v1583_v41  ;;  %v1905_v2 = vadd.f32 %v362_v29, %v1724_v38  ;;  %v756_v29 = vand.u32 127, %v152_v32 }
 0x19d   :  { %v366_v30 = vpop.f32.mrb[46].mxu0  ;;  %vm757_vm1 = vcmp.lt.s32.totalorder %v756_v29, 8 }
 0x19e   :  { %v367_v63 = vadd.f32 %v366_v30, %v1742_v52  ;;  %1380 = vmatpush3.bf16.msra.mxu1 %v1379_v56  ;;  %v368_v1 = vpop.f32.mrb[47].mxu0 }
 0x19f   :  { %1381 = vmatprep.subr.bf16.mxu1 %v1583_v41  ;;  %v1909_v42 = vadd.f32 %v368_v1, %v1724_v38 }
 0x1a0   :  { %v1349_v43 = vpack.c.bf16 %v367_v63, %v361_v33 }
 0x1a1   :  { %v1397_v45 = vpack.c.bf16 %v1909_v42, %v1905_v2  ;;  %v372_v7 = vpop.f32.mrb[48].mxu0 }
 0x1a2   :  { %1350 = vmatpush3.bf16.xpose.msra.mxu0 %v1349_v43  ;;  %1383 = vmatpush3.bf16.msra.mxu1 %v1382_v9  ;;  %v374_v53 = vpop.f32.mrb[49].mxu0  ;;  %v373_v56 = vadd.f32 %v372_v7, %v1742_v52 }
 0x1a3   :  { %1384 = vmatprep.subr.bf16.mxu1 %v1583_v41  ;;  %1351 = vmatprep.subr.bf16.mxu0 %v1583_v41  ;;  %v1924_v15 = vadd.f32 %v374_v53, %v1724_v38 }
 0x1a5   :  { %v378_v54 = vpop.f32.mrb[50].mxu0 }
 0x1a6   :  { %v379_v13 = vadd.f32 %v378_v54, %v1742_v52  ;;  %1386 = vmatpush3.bf16.msra.mxu1 %v1385_v25  ;;  %v380_v14 = vpop.f32.mrb[51].mxu0 }
 0x1a7   :  { %v1927_v3 = vadd.f32 %v380_v14, %v1724_v38  ;;  %1387 = vmatprep.subr.bf16.mxu1 %v1583_v41 }
 0x1a8   :  { %v1352_v4 = vpack.c.bf16 %v379_v13, %v373_v56 }
 0x1a9   :  { %v1400_v9 = vpack.c.bf16 %v1927_v3, %v1924_v15  ;;  %v384_v16 = vpop.f32.mrb[52].mxu0 }
 0x1aa   :  { %1353 = vmatpush3.bf16.xpose.msra.mxu0 %v1352_v4  ;;  %v386_v17 = vpop.f32.mrb[53].mxu0  ;;  %v385_v21 = vadd.f32 %v384_v16, %v1742_v52 }
 0x1ab   :  { %1354 = vmatprep.subr.bf16.mxu0 %v1583_v41  ;;  %v1936_v25 = vadd.f32 %v386_v17, %v1724_v38 }
 0x1ad   :  { %v390_v18 = vpop.f32.mrb[54].mxu0 }
 0x1ae   :  { %v391_v23 = vadd.f32 %v390_v18, %v1742_v52  ;;  %v392_v24 = vpop.f32.mrb[55].mxu0 }
 0x1af   :  { %v1939_v26 = vadd.f32 %v392_v24, %v1724_v38 }
 0x1b0   :  { %v1355_v27 = vpack.c.bf16 %v391_v23, %v385_v21 }
 0x1b1   :  { %v1403_v28 = vpack.c.bf16 %v1939_v26, %v1936_v25  ;;  %v396_v31 = vpop.f32.mrb[56].mxu0 }
 0x1b2   :  { %1356 = vmatpush3.bf16.xpose.msra.mxu0 %v1355_v27  ;;  %v398_v34 = vpop.f32.mrb[57].mxu0  ;;  %v397_v36 = vadd.f32 %v396_v31, %v1742_v52 }
 0x1b3   :  { %1357 = vmatprep.subr.bf16.mxu0 %v1583_v41  ;;  %v399_v8 = vadd.f32 %v398_v34, %v1724_v38 }
 0x1b5   :  { %v402_v35 = vpop.f32.mrb[58].mxu0 }
 0x1b6   :  { %v403_v40 = vadd.f32 %v402_v35, %v1742_v52  ;;  %v404_v46 = vpop.f32.mrb[59].mxu0 }
 0x1b7   :  { %v405_v11 = vadd.f32 %v404_v46, %v1724_v38 }
 0x1b8   :  { %v1358_v47 = vpack.c.bf16 %v403_v40, %v397_v36 }
 0x1b9   :  { %v1406_v48 = vpack.c.bf16 %v405_v11, %v399_v8  ;;  %v408_v49 = vpop.f32.mrb[60].mxu0 }
 0x1ba   :  { %1359 = vmatpush3.bf16.xpose.msra.mxu0 %v1358_v47  ;;  %v410_v61 = vpop.f32.mrb[61].mxu0  ;;  %v409_v5 = vadd.f32 %v408_v49, %v1742_v52 }
 0x1bb   :  { %1360 = vmatprep.subr.bf16.mxu0 %v1583_v41  ;;  %v411_v55 = vadd.f32 %v410_v61, %v1724_v38 }
 0x1bd   :  { %v414_v51 = vpop.f32.mrb[62].mxu0 }
 0x1be   :  { %v415_v6 = vadd.f32 %v414_v51, %v1742_v52  ;;  %v416_v12 = vpop.f32.mrb[63].mxu0 }
 0x1bf   :  { %v417_v57 = vadd.f32 %v416_v12, %v1724_v38 }
 0x1c0   :  { %v1361_v20 = vpack.c.bf16 %v415_v6, %v409_v5 }
 0x1c1   :  { %v1409_v62 = vpack.c.bf16 %v417_v57, %v411_v55 }
 0x1c2   :  { %1362 = vmatpush3.bf16.xpose.msra.mxu0 %v1361_v20 }
 0x1c9   :  { %1179 = vmatmul.mubr.f32.vlgmr.msra.gmra.mrb[64].mxu0 %v1769_v10 }
 0x25c   :  { %v681_v30 = vpop.f32.mrb[2].mxu1 }
 0x25d   :  { %v758_v33 = vsel %vm757_vm1, %v681_v30, -1e+30  ;;  %v1145_v63 = vpop.f32.mrb[3].mxu1 }
 0x25e   :  { %760 = vmax.xlane.f32.xlu0 %v758_v33 }
 0x29c   :  { %v751_v1 = vpop.f32.mrb[64].mxu0 }
 0x29d   :  { %v759_v43 = vsel %vm757_vm1, %v751_v1, -1e+30  ;;  %v1180_v52 = vpop.f32.mrb[65].mxu0 }
 0x29e   :  { %762 = vmax.xlane.f32.xlu0 %v759_v43 }
 0x2eb   :  { %v761_v7 = vpop.xlane.xlu0 %760 }
 0x2ec   :  { %v764_v53 = vsub.f32 %v758_v33, %v761_v7 }
 0x2ee   :  { %v766_v54 = vmul.f32 1.442695, %v764_v53 }
 0x2f0   :  { %1424 = vpow2.f32 %v766_v54 }
 0x2fa   :  { %v1425_v38 = vpop.eup %1424 }
 0x2fb   :  { %770 = vadd.xlane.f32.xlu1 %v1425_v38 }
 0x32b   :  { %v763_v56 = vpop.xlane.xlu0 %762 }
 0x32c   :  { %v765_v13 = vsub.f32 %v759_v43, %v763_v56 }
 0x32e   :  { %v768_v10 = vmul.f32 1.442695, %v765_v13 }
 0x330   :  { %1426 = vpow2.f32 %v768_v10 }
 0x33a   :  { %v1427_v32 = vpop.eup %1426 }
 0x33b   :  { %772 = vadd.xlane.f32.xlu1 %v1427_v32 }
 0x388   :  { %v771_v14 = vpop.xlane.xlu1 %770 }
 0x389   :  { %1428 = vrcp.f32 %v771_v14 }
 0x393   :  { %v1429_v4 = vpop.eup %1428 }
 0x394   :  { %v775_v16 = vmul.f32 %v1429_v4, %v1425_v38 }
 0x396   :  { %1214 = vmatmul.mubr.f32.vlgmr.msra.gmra.mrb[4].mxu1 %v775_v16  ;;  %952 = vst [vmem:[#allocation13] sm:$0xff] %v775_v16 }
 0x397   :  { %1389 = vmatpush3.bf16.msra.mxu1 %v1388_v44  ;;  %1248 = vmatprep.mubr.msk.f32.mxu1 %vm1584_vm0, %v1582_v0 }
 0x398   :  { %1390 = vmatprep.subr.bf16.mxu1 %v1583_v41 }
 0x39b   :  { %1392 = vmatpush3.bf16.msra.mxu1 %v1391_v50 }
 0x39c   :  { %1393 = vmatprep.subr.bf16.mxu1 %v1583_v41 }
 0x39f   :  { %1395 = vmatpush3.bf16.msra.mxu1 %v1394_v22 }
 0x3a0   :  { %1396 = vmatprep.subr.bf16.mxu1 %v1583_v41 }
 0x3a3   :  { %1398 = vmatpush3.bf16.msra.mxu1 %v1397_v45 }
 0x3a4   :  { %1399 = vmatprep.subr.bf16.mxu1 %v1583_v41 }
 0x3a7   :  { %1401 = vmatpush3.bf16.msra.mxu1 %v1400_v9 }
 0x3a8   :  { %1402 = vmatprep.subr.bf16.mxu1 %v1583_v41 }
 0x3ab   :  { %1404 = vmatpush3.bf16.msra.mxu1 %v1403_v28 }
 0x3ac   :  { %1405 = vmatprep.subr.bf16.mxu1 %v1583_v41 }
 0x3af   :  { %1407 = vmatpush3.bf16.msra.mxu1 %v1406_v48 }
 0x3b0   :  { %1408 = vmatprep.subr.bf16.mxu1 %v1583_v41 }
 0x3b3   :  { %1410 = vmatpush3.bf16.msra.mxu1 %v1409_v62 }
 0x3c8   :  { %v773_v0 = vpop.xlane.xlu1 %772 }
 0x3c9   :  { %1430 = vrcp.f32 %v773_v0 }
 0x3d3   :  { %v1431_v37 = vpop.eup %1430 }
 0x3d4   :  { %v777_v39 = vmul.f32 %v1431_v37, %v1427_v32 }
 0x3d6   :  { %1249 = vmatmul.mubr.f32.vlgmr.msra.gmra.mrb[6].mxu1 %v777_v39  ;;  %953 = vst [vmem:[#allocation13 + $0x8] sm:$0xff] %v777_v39 }
 0x3d7   :  { %1531 = shalt.err (!%p1528_p8)
}
 0x3d8   :  { %s1532_s12 = scalar_lea.hbm %s2019_s7, 256 }
 0x3d9   :  { %p1533_p9 = scmp.ne.s32.totalorder %s2019_s7, %s1532_s12  ;;  %p1536_p10 = scmp.lt.u32.totalorder %s1532_s12, %s2019_s7 }
 0x3db   :  { %p1538_p11 = pnand %p1536_p10, %p1533_p9 }
 0x3dd   :  { %1541 = shalt.err (!%p1538_p11)
}
 0x3de   :  { %977 = dma.vmem_to_hbm [thread:$0]  %s972_s8, 256, %s2019_s7, [#allocation14], %s1576_s13, %s1576_s13, %s1577_s14  }
 0x3df   :  { %s1586_s19 = smov [#allocation12]  }
 0x3e0   :  { %s959_s20 = sshll.u32 %s1586_s19, 4  ;;  %s960_s20 = int_to_ptr.vmem [resolvable:$true] %s959_s20 }
 0x3e1   :  { %s1542_s21 = scalar_lea.vmem %s960_s20, 256  ;;  %p1547_p13 = scmp.lt.s32.totalorder %s960_s20, %s960_s20 }
 0x3e2   :  { %p1543_p12 = scmp.ne.s32.totalorder %s960_s20, %s1542_s21  ;;  %p1548_p0 = scmp.lt.s32.totalorder %s1542_s21, %s1542_s21 }
 0x3e4   :  { %p1549_p1 = por %p1548_p0, %p1547_p13 }
 0x3e6   :  { %p1550_p2 = pnand %p1549_p1, %p1543_p12 }
 0x469   :  { %v876_v41 = vpop.f32.mrb[4].mxu1 }
 0x46a   :  { %950 = vst [vmem:[#allocation12] sm:$0xff] %v876_v41  ;;  %v1215_v44 = vpop.f32.mrb[5].mxu1 }
 0x4a9   :  { %v946_v58 = vpop.f32.mrb[6].mxu1 }
 0x4aa   :  { %951 = vst [vmem:[#allocation12 + $0x8] sm:$0xff] %v946_v58  ;;  %v1250_v59 = vpop.f32.mrb[7].mxu1 }
 0x4ab   :  { %1553 = shalt.err (!%p1550_p2)
}
 0x4ac   :  { %s1554_s7 = scalar_lea.hbm %s2018_s6, 256 }
 0x4ad   :  { %p1555_p3 = scmp.ne.s32.totalorder %s2018_s6, %s1554_s7  ;;  %p1558_p4 = scmp.lt.u32.totalorder %s1554_s7, %s2018_s6 }
 0x4af   :  { %p1560_p5 = pnand %p1558_p4, %p1555_p3 }
 0x4b1   :  { %1563 = shalt.err (!%p1560_p5)
}
 0x4b2   :  { %965 = dma.vmem_to_hbm [thread:$0]  %s960_s20, 256, %s2018_s6, [#allocation6], %s1576_s13, %s1576_s13, %s1577_s14  }
 0x4b3   :  { %1570 = dma.done.wait [#allocation6], 256  }
 0x4b4   :  { %1571 = vsyncadd [#allocation6], 4294967040 }
 0x4b5   :  { %1572 = dma.done.wait [#allocation14], 256  }
 0x4b6   :  { %1573 = vsyncadd [#allocation14], 4294967040 }
 0x4b7   :  { %984 = vsyncpa [#allocation5], 1 }
 0x4b8   :  { %985 = vsyncpa [#allocation8], 1 }
 0x4b9   :  { %986 = vsyncpa [#allocation11], 1 }
 0x4ba   :  { %987 = vsyncpa [#allocation6], 1 }
 0x4bb   :  { %988 = vsyncpa [#allocation14], 1 }

</bundles_post_ra>
